<compile_context>
chip_gen: v6e
topology: v6e:2x2x1
jax: 0.10.0
libtpu: 0.0.40
codegen_flags: <defaults>
</compile_context>

<pallas_src>
import jax
import jax.numpy as jnp
from jax.experimental import pallas as pl
from jax.experimental.pallas import tpu as pltpu

_LANE = 128
_SUBLANE = 8
# 1024-row f32 activation tiles: 2 x (1024*784*4B) ~= 6.3 MiB double-buffered
# plus ~0.7 MiB weight/output buffers -- fits every generation's scoped-VMEM
# default (v5e 16 MiB, v6e/v7x 32 MiB) and sits at the measured tile-sweep knee.
_MAX_BATCH_BLOCK = 1024


def _round_up(x, m):
    return ((x + m - 1) // m) * m


def _fused_linear_kernel(x_ref, w_ref, b_ref, o_ref):
    # x_ref: (block_n, D) f32     w_ref: (D, O_pad) bf16
    # b_ref: (1, O_pad)  f32      o_ref: (block_n, O_pad) bf16
    # f32 -> bf16 cast happens here (VPU, hidden under DMA) instead of in a
    # separate XLA pass over HBM.
    acc = jnp.dot(x_ref[...].astype(jnp.bfloat16), w_ref[...],
                  preferred_element_type=jnp.float32)
    o_ref[...] = (acc + b_ref[...]).astype(jnp.bfloat16)


def prepare_params(w1, b1, w2, b2):
    """One-time parameter preprocessing (hoisted out of the forward path).

    w1: (hidden, D), b1: (hidden,), w2: (O, hidden), b2: (O,) -- PyTorch layout.
    Returns (w_eff_bf16 (D, O_pad), b_eff_f32 (1, O_pad), out_dim).
    """
    out_dim = w2.shape[0]
    d = w1.shape[1]
    # (x @ W1^T + b1) @ W2^T + b2  ==  x @ (W1^T @ W2^T) + (b1 @ W2^T + b2)
    w_eff = w1.T.astype(jnp.float32) @ w2.T.astype(jnp.float32)        # (D, O)
    b_eff = b1.astype(jnp.float32) @ w2.T.astype(jnp.float32) + b2     # (O,)
    o_pad = _round_up(out_dim, _LANE)                                  # 10 -> 128
    w_eff_p = jnp.zeros((d, o_pad), jnp.float32).at[:, :out_dim].set(w_eff)
    b_eff_p = jnp.zeros((1, o_pad), jnp.float32).at[:, :out_dim].set(b_eff)
    return w_eff_p.astype(jnp.bfloat16), b_eff_p, out_dim


def fashion_mnist_model_v0(x_nchw, w_eff, b_eff, out_dim):
    """Forward pass: logits = flatten(x) @ W_eff + b_eff (sliced to out_dim)."""
    n = x_nchw.shape[0]
    d = x_nchw.shape[1] * x_nchw.shape[2] * x_nchw.shape[3]
    o_pad = w_eff.shape[1]

    if n == 0:
        return jnp.zeros((0, out_dim), jnp.float32)

    # nn.Flatten(): free contiguous reshape; stays f32 (cast happens in-kernel).
    x_flat = x_nchw.reshape(n, d)

    # Sublane-aligned batch blocks, capped at _MAX_BATCH_BLOCK, chosen so the
    # grid has >= 2 steps when the batch allows it (v7x megacore sharding).
    if n <= _SUBLANE:
        block_n = n                      # full-dim block satisfies (8,128) rule
    else:
        block_n = min(_MAX_BATCH_BLOCK, _round_up(pl.cdiv(n, 2), _SUBLANE))
    grid = (pl.cdiv(n, block_n),)        # partial last block masked by Pallas

    cost = pl.CostEstimate(
        flops=2 * n * d * o_pad,
        transcendentals=0,
        bytes_accessed=n * d * 4 + n * o_pad * 2 + d * o_pad * 2 + o_pad * 4)

    out_padded = pl.pallas_call(
        _fused_linear_kernel,
        out_shape=jax.ShapeDtypeStruct((n, o_pad), jnp.bfloat16),
        grid=grid,
        in_specs=[
            pl.BlockSpec((block_n, d), lambda i: (i, 0)),   # batch-tiled x (f32)
            pl.BlockSpec((d, o_pad), lambda i: (0, 0)),     # resident fused weight
            pl.BlockSpec((1, o_pad), lambda i: (0, 0)),     # resident fused bias
        ],
        out_specs=pl.BlockSpec((block_n, o_pad), lambda i: (i, 0)),
        compiler_params=pltpu.CompilerParams(
            dimension_semantics=("parallel",)),
        cost_estimate=cost,
    )(x_flat, w_eff, b_eff)

    return out_padded[:, :out_dim].astype(jnp.float32)


if __name__ == "__main__":
    # Shapes consistent with FashionMNIST: 1x28x28 images, small batch.
    batch, channels, height, width = 8, 1, 28, 28
    input_shape = channels * height * width   # 784
    hidden_units = 32
    output_shape = 10

    key = jax.random.PRNGKey(0)
    kx, kw1, kb1, kw2, kb2 = jax.random.split(key, 5)

    x = jax.random.normal(kx, (batch, channels, height, width), dtype=jnp.float32)

    # Deterministic init mimicking nn.Linear's uniform(-1/sqrt(in), 1/sqrt(in)).
    lim1 = 1.0 / jnp.sqrt(jnp.float32(input_shape))
    w1 = jax.random.uniform(kw1, (hidden_units, input_shape), jnp.float32, -lim1, lim1)
    b1 = jax.random.uniform(kb1, (hidden_units,), jnp.float32, -lim1, lim1)
    lim2 = 1.0 / jnp.sqrt(jnp.float32(hidden_units))
    w2 = jax.random.uniform(kw2, (output_shape, hidden_units), jnp.float32, -lim2, lim2)
    b2 = jax.random.uniform(kb2, (output_shape,), jnp.float32, -lim2, lim2)

    # One-time preprocessing (would be done at param-load time in practice).
    w_eff, b_eff, out_dim = prepare_params(w1, b1, w2, b2)

    out = fashion_mnist_model_v0(x, w_eff, b_eff, out_dim)
    out = jax.block_until_ready(out)

    # Pure-JAX f32 reference of the original two-linear forward.
    x_flat = x.reshape(batch, -1)
    ref = (x_flat @ w1.T + b1) @ w2.T + b2
    assert out.shape == (batch, output_shape)
    # Tolerance reflects bf16 MXU inputs / bf16 logits with f32 accumulation.
    assert jnp.allclose(out, ref, atol=3e-2, rtol=3e-2)

    print("KERNEL_OK")
</pallas_src>

<mosaic_0001>
module attributes {stable_mosaic.version = 11 : i64} {
  func.func @_fused_linear_kernel(%arg0: i32, %arg1: memref<8x784xf32, #tpu.memory_space<vmem>>, %arg2: memref<784x128xbf16, #tpu.memory_space<vmem>>, %arg3: memref<1x128xf32, #tpu.memory_space<vmem>>, %arg4: memref<8x128xbf16, #tpu.memory_space<vmem>>) attributes {dimension_semantics = [#tpu.dimension_semantics<parallel>], iteration_bounds = array<i64: 1>, scalar_prefetch = 0 : i64, scratch_operands = 0 : i64, tpu.core_type = #tpu.core_type<tc>, window_params = [{transform_indices = @transform_0, window_bounds = array<i64: 8, 784>}, {pipeline_mode = #tpu.pipeline_mode<synchronous>, transform_indices = @transform_1, window_bounds = array<i64: 784, 128>}, {pipeline_mode = #tpu.pipeline_mode<synchronous>, transform_indices = @transform_2, window_bounds = array<i64: 1, 128>}, {transform_indices = @transform_3, window_bounds = array<i64: 8, 128>}]} {
    %c0 = arith.constant 0 : index
    %c0_0 = arith.constant 0 : index
    %0 = vector.load %arg1[%c0, %c0_0] : memref<8x784xf32, #tpu.memory_space<vmem>>, vector<8x784xf32>
    %1 = arith.truncf %0 : vector<8x784xf32> to vector<8x784xbf16>
    %c0_1 = arith.constant 0 : index
    %c0_2 = arith.constant 0 : index
    %2 = vector.load %arg2[%c0_1, %c0_2] : memref<784x128xbf16, #tpu.memory_space<vmem>>, vector<784x128xbf16>
    %cst = arith.constant dense<0.000000e+00> : vector<8x128xf32>
    %3 = tpu.matmul %1, %2, %cst {dimension_numbers = #tpu.dot_dimension_numbers<[1], [0], [0], [1], [0, 0, 1, 1], [], []>} : vector<8x784xbf16>, vector<784x128xbf16>, vector<8x128xf32> -> vector<8x128xf32>
    %c0_3 = arith.constant 0 : index
    %c0_4 = arith.constant 0 : index
    %4 = vector.load %arg3[%c0_3, %c0_4] : memref<1x128xf32, #tpu.memory_space<vmem>>, vector<1x128xf32>
    %5 = vector.broadcast %4 : vector<1x128xf32> to vector<8x128xf32>
    %6 = arith.addf %3, %5 : vector<8x128xf32>
    %7 = arith.truncf %6 : vector<8x128xf32> to vector<8x128xbf16>
    %c0_5 = arith.constant 0 : index
    %c0_6 = arith.constant 0 : index
    %8 = vector.load %arg4[%c0_5, %c0_6] : memref<8x128xbf16, #tpu.memory_space<vmem>>, vector<8x128xbf16>
    tpu.vector_store %arg4[%c0_5, %c0_6], %7 {strides = array<i32>} : memref<8x128xbf16, #tpu.memory_space<vmem>>, vector<8x128xbf16>,
    return
  }
  func.func @transform_0(%arg0: i32) -> (i32, i32) {
    %c0_i32 = arith.constant 0 : i32
    %c0_i32_0 = arith.constant 0 : i32
    return %arg0, %c0_i32 : i32, i32
  }
  func.func @transform_1(%arg0: i32) -> (i32, i32) {
    %c0_i32 = arith.constant 0 : i32
    %c0_i32_0 = arith.constant 0 : i32
    %c0_i32_1 = arith.constant 0 : i32
    return %c0_i32, %c0_i32_0 : i32, i32
  }
  func.func @transform_2(%arg0: i32) -> (i32, i32) {
    %c0_i32 = arith.constant 0 : i32
    %c0_i32_0 = arith.constant 0 : i32
    %c0_i32_1 = arith.constant 0 : i32
    return %c0_i32, %c0_i32_0 : i32, i32
  }
  func.func @transform_3(%arg0: i32) -> (i32, i32) {
    %c0_i32 = arith.constant 0 : i32
    %c0_i32_0 = arith.constant 0 : i32
    return %arg0, %c0_i32 : i32, i32
  }
}

</mosaic_0001>

<bundles_post_ra>
// kernel: tpu_custom_call.1
= control target key start
LH: loop header
LB: loop body
LE: loop exit
PB: predicated region body
PF: predicated region fallthrough
CT: control target
= control target key end

     0   :  { %8 = vsyncpa [#allocation3], 0  ;;  %s923_s0 = inlined_call_operand.hbm [shape: f32[8,784], index: 0, kind: input, shape index: {}]   ;;  %s924_s1 = inlined_call_operand.hbm [shape: bf16[784,128], index: 1, kind: input, shape index: {}]   ;;  %s925_s2 = inlined_call_operand.vmem [shape: f32[1,128], index: 2, kind: input, shape index: {}]   ;;  %s926_s3 = inlined_call_operand.hbm [shape: bf16[8,128], index: 3, kind: output, shape index: {}]  }
   0x1   :  { %9 = vsyncpa [#allocation6], 0 }
   0x2   :  { %10 = vsyncpa [#allocation4], 0  ;;  %s884_s12 = smov [#allocation2]   ;;  %s885_s14 = smov [#allocation5]  }
   0x3   :  { %s17_s13 = sshll.u32 %s884_s12, 4  ;;  %s26_s15 = sshll.u32 %s885_s14, 4  ;;  %s18_s13 = int_to_ptr.vmem [resolvable:$true] %s17_s13  ;;  %s27_s15 = int_to_ptr.vmem [resolvable:$true] %s26_s15 }
   0x4   :  { %s826_s16 = scalar_lea.vmem %s18_s13, 896  ;;  %p831_p1 = scmp.lt.s32.totalorder %s18_s13, %s18_s13 }
   0x5   :  { %p827_p0 = scmp.ne.s32.totalorder %s18_s13, %s826_s16  ;;  %p832_p2 = scmp.lt.s32.totalorder %s826_s16, %s826_s16 }
   0x7   :  { %p833_p3 = por %p832_p2, %p831_p1 }
   0x9   :  { %p834_p4 = pnand %p833_p3, %p827_p0 }
   0xb   :  { %837 = shalt.err (!%p834_p4)
}
   0xc   :  { %20 = dma.hbm_to_vmem [thread:$0]  %s923_s0, 896, %s18_s13, [#allocation3]  }
   0xd   :  { %s846_s19 = scalar_lea.vmem %s27_s15, 6272  ;;  %p851_p6 = scmp.lt.s32.totalorder %s27_s15, %s27_s15 }
   0xe   :  { %p847_p5 = scmp.ne.s32.totalorder %s27_s15, %s846_s19  ;;  %p852_p7 = scmp.lt.s32.totalorder %s846_s19, %s846_s19 }
  0x10   :  { %p853_p8 = por %p852_p7, %p851_p6 }
  0x12   :  { %p854_p9 = pnand %p853_p8, %p847_p5 }
  0x14   :  { %857 = shalt.err (!%p854_p9)
}
  0x15   :  { %s886_s20 = smov 64   ;;  %s887_s21 = smov 4  }
  0x16   :  { %32 = dma.hbm_to_vmem [thread:$0]  %s924_s1, 6272, %s27_s15, [#allocation6], %s886_s20, %s886_s20, %s887_s21  }
  0x17   :  { %878 = dma.done.wait [#allocation3], 896  }
  0x18   :  { %879 = vsyncadd [#allocation3], 4294966400 }
  0x19   :  { %880 = dma.done.wait [#allocation6], 6272  }
  0x1a   :  { %881 = vsyncadd [#allocation6], 4294961024  ;;  %v769_v0 = vld [vmem:[#allocation5 + $0x78] sm:$0xff]   ;;  %v773_v4 = vld [vmem:[#allocation5 + $0x70] sm:$0xff]   ;;  %v888_v44 = vmov 0.0   ;;  %vm889_vm0 = vmmov 0  }
  0x1b   :  { %v770_v1 = vld [vmem:[#allocation5 + $0x38] sm:$0xff]   ;;  %688 = vmatprep.subr.bf16.mxu0 %v769_v0  ;;  %v774_v5 = vld [vmem:[#allocation5 + $0x30] sm:$0xff]   ;;  %v777_v8 = vld [vmem:[#allocation5 + $0x68] sm:$0xff]   ;;  %vm455_vm1 = vcmask 130048   ;;  %s890_s24 = smov [#allocation7]  }
  0x1c   :  { %v771_v2 = vld [vmem:[#allocation5 + $0xf8] sm:$0xff]   ;;  %689 = vmatpush3.bf16.msra.mxu0 %v770_v1  ;;  %v775_v6 = vld [vmem:[#allocation5 + $0xf0] sm:$0xff]   ;;  %v778_v9 = vld [vmem:[#allocation5 + $0x28] sm:$0xff]   ;;  %s627_s25 = sshll.u32 %s890_s24, 4  ;;  %s628_s25 = int_to_ptr.vmem [resolvable:$true] %s627_s25 }
  0x1d   :  { %v772_v3 = vld [vmem:[#allocation5 + $0xb8] sm:$0xff]   ;;  %710 = vmatprep.subr.bf16.mxu1 %v771_v2  ;;  %690 = vmatprep.subr.bf16.mxu0 %v773_v4  ;;  %v776_v7 = vld [vmem:[#allocation5 + $0xb0] sm:$0xff]   ;;  %v779_v10 = vld [vmem:[#allocation5 + $0xe8] sm:$0xff]   ;;  %s858_s26 = scalar_lea.vmem %s628_s25, 64  ;;  %p863_p11 = scmp.lt.s32.totalorder %s628_s25, %s628_s25 }
  0x1e   :  { %711 = vmatpush3.bf16.msra.mxu1 %v772_v3  ;;  %v780_v11 = vld [vmem:[#allocation5 + $0xa8] sm:$0xff]   ;;  %v781_v12 = vld [vmem:[#allocation5 + $0x60] sm:$0xff]   ;;  %v785_v16 = vld [vmem:[#allocation5 + $0x58] sm:$0xff]   ;;  %p859_p10 = scmp.ne.s32.totalorder %s628_s25, %s858_s26  ;;  %p864_p12 = scmp.lt.s32.totalorder %s858_s26, %s858_s26 }
  0x1f   :  { %712 = vmatprep.subr.bf16.mxu1 %v775_v6  ;;  %v782_v13 = vld [vmem:[#allocation5 + $0x20] sm:$0xff]   ;;  %v786_v17 = vld [vmem:[#allocation5 + $0x18] sm:$0xff]   ;;  %v789_v20 = vld [vmem:[#allocation5 + $0x50] sm:$0xff]  }
  0x20   :  { %691 = vmatpush3.bf16.msra.mxu0 %v774_v5  ;;  %v783_v14 = vld [vmem:[#allocation5 + $0xe0] sm:$0xff]   ;;  %v787_v18 = vld [vmem:[#allocation5 + $0xd8] sm:$0xff]   ;;  %v790_v21 = vld [vmem:[#allocation5 + $0x10] sm:$0xff]   ;;  %p865_p13 = por %p864_p12, %p863_p11 }
  0x21   :  { %692 = vmatprep.subr.bf16.mxu0 %v777_v8  ;;  %v784_v15 = vld [vmem:[#allocation5 + $0xa0] sm:$0xff]   ;;  %v788_v19 = vld [vmem:[#allocation5 + $0x98] sm:$0xff]   ;;  %v791_v22 = vld [vmem:[#allocation5 + $0xd0] sm:$0xff]  }
  0x22   :  { %713 = vmatpush3.bf16.msra.mxu1 %v776_v7  ;;  %v792_v23 = vld [vmem:[#allocation5 + $0x90] sm:$0xff]   ;;  %v793_v24 = vld [vmem:[#allocation5 + $0x48] sm:$0xff]   ;;  %v797_v28 = vld [vmem:[#allocation5 + $0x40] sm:$0xff]   ;;  %p866_p0 = pnand %p865_p13, %p859_p10 }
  0x23   :  { %714 = vmatprep.subr.bf16.mxu1 %v779_v10  ;;  %v794_v25 = vld [vmem:[#allocation5 + $0x8] sm:$0xff]   ;;  %v798_v29 = vld [vmem:[#allocation5] sm:$0xff]   ;;  %v43_v31 = vld [vmem:[#allocation2 + $0x8] sm:$0xff] }
  0x24   :  { %693 = vmatpush3.bf16.msra.mxu0 %v778_v9  ;;  %v795_v26 = vld [vmem:[#allocation5 + $0xc8] sm:$0xff]   ;;  %v799_v30 = vld [vmem:[#allocation5 + $0xc0] sm:$0xff]   ;;  %v50_v32 = vpack.c.bf16 %v43_v31, %v43_v31  ;;  %v801_v36 = vld [vmem:[#allocation5 + $0x178] sm:$0xff]  }
  0x25   :  { %694 = vmatprep.subr.bf16.mxu0 %v781_v12  ;;  %v796_v27 = vld [vmem:[#allocation5 + $0x88] sm:$0xff]   ;;  %v800_v33 = vld [vmem:[#allocation5 + $0x80] sm:$0xff]   ;;  %v802_v39 = vld [vmem:[#allocation5 + $0x138] sm:$0xff]  }
  0x26   :  { %715 = vmatpush3.bf16.msra.mxu1 %v780_v11  ;;  %v42_v34 = vld [vmem:[#allocation2] sm:$0xff]  ;;  %v45_v37 = vld [vmem:[#allocation2 + $0x18] sm:$0xff]  ;;  %491 = vmatprep.mubr.bf16.mxu0 %v50_v32  ;;  %v44_v40 = vld [vmem:[#allocation2 + $0x10] sm:$0xff] }
  0x27   :  { %716 = vmatprep.subr.bf16.mxu1 %v783_v14  ;;  %v49_v35 = vpack.c.bf16 %v42_v34, %v42_v34  ;;  %v52_v38 = vpack.c.bf16 %v45_v37, %v45_v37  ;;  %v51_v41 = vpack.c.bf16 %v44_v40, %v44_v40  ;;  %v803_v42 = vld [vmem:[#allocation5 + $0x170] sm:$0xff]   ;;  %v805_v45 = vld [vmem:[#allocation5 + $0x168] sm:$0xff]   ;;  %v807_v47 = vld [vmem:[#allocation5 + $0x160] sm:$0xff]  }
  0x28   :  { %695 = vmatpush3.bf16.msra.mxu0 %v782_v13  ;;  %v804_v43 = vld [vmem:[#allocation5 + $0x130] sm:$0xff]   ;;  %v806_v46 = vld [vmem:[#allocation5 + $0x128] sm:$0xff]   ;;  %v808_v48 = vld [vmem:[#allocation5 + $0x120] sm:$0xff]  }
  0x29   :  { %696 = vmatprep.subr.bf16.mxu0 %v785_v16  ;;  %531 = vmatprep.mubr.bf16.mxu1 %v52_v38  ;;  %v809_v49 = vld [vmem:[#allocation5 + $0x158] sm:$0xff]   ;;  %v811_v51 = vld [vmem:[#allocation5 + $0x150] sm:$0xff]   ;;  %v817_v52 = vld [vmem:[#allocation5 + $0x180] sm:$0xff]  }
  0x2a   :  { %717 = vmatpush3.bf16.msra.mxu1 %v784_v15  ;;  %v810_v50 = vld [vmem:[#allocation5 + $0x118] sm:$0xff]   ;;  %v47_v53 = vld [vmem:[#allocation2 + $0x28] sm:$0xff]  ;;  %v813_v58 = vld [vmem:[#allocation5 + $0x148] sm:$0xff]  }
  0x2b   :  { %718 = vmatprep.subr.bf16.mxu1 %v787_v18  ;;  %v54_v54 = vpack.c.bf16 %v47_v53, %v47_v53  ;;  %v48_v55 = vld [vmem:[#allocation2 + $0x30] sm:$0xff]  ;;  %v812_v56 = vld [vmem:[#allocation5 + $0x110] sm:$0xff]   ;;  %v814_v59 = vld [vmem:[#allocation5 + $0x108] sm:$0xff]  }
  0x2c   :  { %697 = vmatpush3.bf16.msra.mxu0 %v786_v17  ;;  %v55_v57 = vpack.c.bf16 %v48_v55, %v48_v55  ;;  %v815_v60 = vld [vmem:[#allocation5 + $0x140] sm:$0xff]   ;;  %v46_v62 = vld [vmem:[#allocation2 + $0x20] sm:$0xff] }
  0x2d   :  { %698 = vmatprep.subr.bf16.mxu0 %v789_v20  ;;  %v816_v61 = vld [vmem:[#allocation5 + $0x100] sm:$0xff]   ;;  %v53_v63 = vpack.c.bf16 %v46_v62, %v46_v62  ;;  %v637_v13 = vld [vmem:[%s925_s2] ss:$0 sm:$0xff] }
  0x2e   :  { %719 = vmatpush3.bf16.msra.mxu1 %v788_v19 }
  0x2f   :  { %720 = vmatprep.subr.bf16.mxu1 %v791_v22 }
  0x30   :  { %699 = vmatpush3.bf16.msra.mxu0 %v790_v21 }
  0x31   :  { %700 = vmatprep.subr.bf16.mxu0 %v793_v24 }
  0x32   :  { %721 = vmatpush3.bf16.msra.mxu1 %v792_v23 }
  0x33   :  { %722 = vmatprep.subr.bf16.mxu1 %v795_v26 }
  0x34   :  { %701 = vmatpush3.bf16.msra.mxu0 %v794_v25 }
  0x35   :  { %702 = vmatprep.subr.bf16.mxu0 %v797_v28 }
  0x36   :  { %723 = vmatpush3.bf16.msra.mxu1 %v796_v27 }
  0x37   :  { %724 = vmatprep.subr.bf16.mxu1 %v799_v30 }
  0x38   :  { %703 = vmatpush3.bf16.msra.mxu0 %v798_v29 }
  0x39   :  { %732 = vmatprep.subr.bf16.mxu0 %v801_v36 }
  0x3a   :  { %725 = vmatpush3.bf16.msra.mxu1 %v800_v33 }
  0x3b   :  { %492 = vmatmul.mubr.bf16.vlgmr.msra.gmra.mxu0 %v49_v35  ;;  %756 = vmatprep.subr.bf16.mxu1 %v888_v44 }
  0x3c   :  { %733 = vmatpush3.bf16.msra.mxu0 %v802_v39  ;;  %571 = vmatprep.mubr.bf16.mxu0 %v54_v54 }
  0x3d   :  { %532 = vmatmul.mubr.bf16.vlgmr.msra.gmra.mxu1 %v51_v41  ;;  %734 = vmatprep.subr.bf16.mxu0 %v803_v42 }
  0x3e   :  { %758 = vmatprep.mubr.msk.bf16.mxu1 %vm889_vm0, %v888_v44  ;;  %757 = vmatpush3.bf16.msra.mxu1 %v817_v52 }
  0x40   :  { %735 = vmatpush3.bf16.msra.mxu0 %v804_v43 }
  0x41   :  { %736 = vmatprep.subr.bf16.mxu0 %v805_v45 }
  0x44   :  { %737 = vmatpush3.bf16.msra.mxu0 %v806_v46 }
  0x45   :  { %738 = vmatprep.subr.bf16.mxu0 %v807_v47  ;;  %759 = vmatmul.mubr.msk.bf16.vlgmr.msra.gmra.mxu1 %vm455_vm1, %v55_v57 }
  0x48   :  { %739 = vmatpush3.bf16.msra.mxu0 %v808_v48 }
  0x49   :  { %740 = vmatprep.subr.bf16.mxu0 %v809_v49 }
  0x4c   :  { %741 = vmatpush3.bf16.msra.mxu0 %v810_v50 }
  0x4d   :  { %742 = vmatprep.subr.bf16.mxu0 %v811_v51 }
  0x50   :  { %743 = vmatpush3.bf16.msra.mxu0 %v812_v56 }
  0x51   :  { %744 = vmatprep.subr.bf16.mxu0 %v813_v58 }
  0x54   :  { %745 = vmatpush3.bf16.msra.mxu0 %v814_v59 }
  0x55   :  { %746 = vmatprep.subr.bf16.mxu0 %v815_v60 }
  0x58   :  { %747 = vmatpush3.bf16.msra.mxu0 %v816_v61 }
  0x5b   :  { %572 = vmatmul.mubr.bf16.vlgmr.msra.gmra.mxu0 %v53_v63 }
  0xfb   :  { %v704_v0 = vpop.f32.mrf.mxu0 }
  0xfd   :  { %v705_v1 = vpop.f32.mrf.mxu0  ;;  %v726_v2 = vpop.f32.mrf.mxu1 }
  0xfe   :  { %v706_v12 = vadd.f32 %v705_v1, %v704_v0 }
  0xff   :  { %v707_v3 = vpop.f32.mrf.mxu0  ;;  %v727_v4 = vpop.f32.mrf.mxu1 }
 0x100   :  { %v494_v14 = vadd.f32 %v706_v12, %v637_v13  ;;  %v728_v15 = vadd.f32 %v727_v4, %v726_v2 }
 0x101   :  { %v708_v5 = vpop.f32.mrf.mxu0  ;;  %v729_v6 = vpop.f32.mrf.mxu1 }
 0x102   :  { %v534_v18 = vadd.f32 %v728_v15, %v494_v14 }
 0x103   :  { %v730_v7 = vpop.f32.mrf.mxu1 }
 0x105   :  { %v613_v8 = vpop.f32.mrf.mxu1 }
 0x107   :  { %v760_v9 = vpop.f32.mrf.mxu1 }
 0x109   :  { %v616_v10 = vpop.f32.mrf.mxu1 }
 0x10b   :  { %v761_v11 = vpop.f32.mrf.mxu1 }
 0x11b   :  { %v748_v16 = vpop.f32.mrf.mxu0 }
 0x11d   :  { %v749_v17 = vpop.f32.mrf.mxu0 }
 0x11e   :  { %v750_v19 = vadd.f32 %v749_v17, %v748_v16 }
 0x11f   :  { %v751_v20 = vpop.f32.mrf.mxu0 }
 0x120   :  { %v574_v21 = vadd.f32 %v750_v19, %v534_v18 }
 0x121   :  { %v752_v22 = vpop.f32.mrf.mxu0 }
 0x122   :  { %v614_v23 = vadd.f32 %v613_v8, %v574_v21 }
 0x124   :  { %v619_v24 = vpack.c.bf16 %v614_v23, %v614_v23 }
 0x126   :  { %620 = vst [vmem:[#allocation7] sm:$0xf] %v619_v24 }
 0x127   :  { %869 = shalt.err (!%p866_p0)
}
 0x128   :  { %630 = dma.vmem_to_hbm [thread:$0]  %s628_s25, 64, %s926_s3, [#allocation4]  }
 0x129   :  { %882 = dma.done.wait [#allocation4], 64  }
 0x12a   :  { %883 = vsyncadd [#allocation4], 4294967232 }
 0x12b   :  { %634 = vsyncpa [#allocation3], 1 }
 0x12c   :  { %635 = vsyncpa [#allocation6], 1 }
 0x12d   :  { %636 = vsyncpa [#allocation4], 1 }

</bundles_post_ra>
